<compile_context>
chip_gen: v5e
topology: v5e:2x2
jax: 0.10.0
libtpu: 0.0.40
codegen_flags: <defaults>
</compile_context>

<pallas_src>
import functools

import jax
import jax.numpy as jnp
from jax import lax
from jax.experimental import pallas as pl
from jax.experimental.pallas import tpu as pltpu

_MASK_NEG = -1e30


@functools.lru_cache(maxsize=None)
def _vmem_limit_bytes():
    """~80% of physical VMEM: ~102 MiB on v5e/v6e (128 MiB), ~51 MiB on v7x (64 MiB)."""
    cap = None
    try:
        cap = getattr(pltpu.get_tpu_info(), "vmem_capacity_bytes", None)
    except Exception:
        cap = None
    if not cap:
        cap = 64 * 1024 * 1024
    return int(cap * 0.8)


def _compiler_params(n_axes):
    return pltpu.CompilerParams(
        dimension_semantics=("parallel",) * n_axes,
        vmem_limit_bytes=_vmem_limit_bytes())


def _pick_row_tile(m):
    for t in (512, 256, 128):
        if m % t == 0:
            return t
    return m


# --------------------------- r_net projection -------------------------------

def _matmul_kernel(x_ref, w_ref, o_ref):
    o_ref[...] = jnp.dot(x_ref[...], w_ref[...],
                         preferred_element_type=jnp.float32).astype(o_ref.dtype)


def linear_nobias(x, w_t, out_dtype=jnp.float32):
    """x: (M, K) @ w_t: (K, N) -> (M, N), row-tiled (weight stays resident)."""
    M, K = x.shape
    _, N = w_t.shape
    tm = _pick_row_tile(M)
    return pl.pallas_call(
        _matmul_kernel,
        out_shape=jax.ShapeDtypeStruct((M, N), out_dtype),
        grid=(M // tm,),
        in_specs=[pl.BlockSpec((tm, K), lambda i: (i, 0)),
                  pl.BlockSpec((K, N), lambda i: (0, 0))],
        out_specs=pl.BlockSpec((tm, N), lambda i: (i, 0)),
        compiler_params=_compiler_params(1),
    )(x, w_t)


# ----------------------- fused attention kernel -----------------------------

def _fused_attn_kernel(scale, n_head, d_head, compute_dtype, exact_recip,
                       w_ref, wqkv_ref, rk_ref, bias2_ref, wo_ref, g_ref, b_ref,
                       o_ref):
    """One batch element: qkv projection + fused AC/BD scores + in-kernel
    rel_shift + causal mask + softmax + P@V + o_net + residual + LayerNorm,
    all in VMEM.  w_ref/o_ref block: (qlen, d_model), lane-dense."""
    qlen, d_model = w_ref.shape
    H = n_head * d_head
    cd = compute_dtype

    wb = w_ref[...]                                            # (qlen, d_model) f32 residual
    heads = jnp.dot(wb.astype(cd), wqkv_ref[...],
                    preferred_element_type=jnp.float32)        # (qlen, 3H) f32
    q2 = heads[:, 0 * H:1 * H]
    k2 = heads[:, 1 * H:2 * H]
    v2c = heads[:, 2 * H:3 * H].astype(cd)
    rk2 = rk_ref[...]                                          # (klen, H)
    klen = rk2.shape[0]

    # Fold r_w_bias / r_r_bias in as two extra LHS rows so q@K^T, q@R^T and both
    # bias rows fall out of ONE fused MXU matmul per head.  Casts hoisted.
    lhs = (jnp.concatenate([q2, bias2_ref[...]], axis=0) * scale).astype(cd)   # (qlen+2, H)
    rhs = jnp.concatenate([k2.astype(cd), rk2.astype(cd)], axis=0)             # (2*klen, H)
    wo = wo_ref[...]                                            # (H, d_model) compute dtype

    # causal mask generated in-kernel (mems=None); it also hides the positions
    # wrapped around by the strided roll below.
    row = lax.broadcasted_iota(jnp.int32, (qlen, klen), 0)
    col = lax.broadcasted_iota(jnp.int32, (qlen, klen), 1)
    keep = col <= row

    dn = (((1,), (1,)), ((), ()))                               # contract last dims
    acc = jnp.zeros((qlen, d_model), jnp.float32)               # o_net accumulator
    for h in range(n_head):
        sl = slice(h * d_head, (h + 1) * d_head)
        s2 = lax.dot_general(lhs[:, sl], rhs[:, sl], dn,
                             preferred_element_type=jnp.float32)   # (qlen+2, 2*klen)
        ac = s2[:qlen, :klen] + s2[qlen:qlen + 1, :klen]            # + rwb @ K^T row
        bd = s2[:qlen, klen:] + s2[qlen + 1:qlen + 2, klen:]        # + rrb @ R^T row
        # rel_shift: right-roll row i by (i + 1) -> one strided XLU rotate.
        bd = pltpu.roll(bd, shift=1, axis=1, stride=1, stride_axis=0)
        s = jnp.where(keep, ac + bd, _MASK_NEG)                     # f32 scores
        m = jnp.max(s, axis=-1, keepdims=True)
        p = jnp.exp(s - m)
        l = jnp.sum(p, axis=-1, keepdims=True)
        oh = jnp.dot(p.astype(cd), v2c[:, sl],
                     preferred_element_type=jnp.float32)            # unnormalized P@V
        oh = oh * pl.reciprocal(l, approx=not exact_recip)          # normalize (qlen, d_head)
        # o_net folded in: accumulate this head's contribution to attn_out.
        acc = acc + jnp.dot(oh.astype(cd), wo[sl, :],
                            preferred_element_type=jnp.float32)

    # residual + LayerNorm (pre_lnorm=False), written lane-dense.
    x = wb + acc
    mu = jnp.mean(x, axis=-1, keepdims=True)
    var = jnp.mean((x - mu) ** 2, axis=-1, keepdims=True)
    o_ref[...] = ((x - mu) * lax.rsqrt(var + 1e-5) * g_ref[...]
                  + b_ref[...]).astype(o_ref.dtype)


# ------------------------------- JAX wrapper ---------------------------------

def rel_partial_learnable_mha(w, r, r_w_bias, r_r_bias, attn_mask, params, *,
                              n_head, d_head, compute_dtype=jnp.bfloat16):
    """Forward of RelPartialLearnableMultiHeadAttn (eval, pre_lnorm=False,
    mems=None, causal mask).  w: (qlen, bsz, d_model), r: (rlen, d_model).
    compute_dtype=bfloat16 (default) for v6e/v7x MXUs; float32 accumulation and
    softmax everywhere."""
    qlen, bsz, d_model = w.shape
    rlen = r.shape[0]
    H = n_head * d_head
    klen = qlen                                        # mems=None
    assert rlen == klen, "mems=None path requires rlen == klen == qlen"
    scale = 1.0 / d_head ** 0.5
    cd = compute_dtype
    exact_recip = (cd == jnp.float32)

    # The kernel builds the standard causal mask internally; verify when the
    # supplied mask is concrete.  TODO(synk): arbitrary attn_mask unsupported.
    if attn_mask is not None:
        try:
            causal = jnp.triu(jnp.ones((qlen, klen), jnp.bool_), k=1)
            ok = bool(jnp.all(jnp.asarray(attn_mask, jnp.bool_) == causal))
        except Exception:                              # tracer: skip the check
            ok = True
        if not ok:
            raise NotImplementedError(
                "only the standard causal attn_mask (mems=None) is supported")

    # r_net projection, lane-dense (rlen, H), stored in compute dtype
    rk2d = linear_nobias(r.astype(cd), params["Wr"].T.astype(cd), out_dtype=cd)

    bias2 = jnp.stack([r_w_bias.reshape(H), r_r_bias.reshape(H)],
                      axis=0).astype(jnp.float32)      # (2, H)
    wqkv_t = params["Wqkv"].T.astype(cd)               # (d_model, 3H)
    wo_t = params["Wo"].T.astype(cd)                   # (H, d_model)
    ln_g = params["ln_g"].reshape(1, d_model).astype(jnp.float32)
    ln_b = params["ln_b"].reshape(1, d_model).astype(jnp.float32)

    # Layout: if d_model is lane-aligned, a free reshape exposes each batch
    # element as a lane-dense (qlen, d_model) block (no HBM->HBM transposes).
    lane_fast = (d_model % 128 == 0) or (bsz == 1)
    if lane_fast:
        w2d = w.reshape(qlen, bsz * d_model)
        io_spec = pl.BlockSpec((qlen, d_model), lambda b: (0, b))
        out_shape = jax.ShapeDtypeStruct((qlen, bsz * d_model), jnp.float32)
    else:
        w2d = jnp.transpose(w, (1, 0, 2)).reshape(bsz * qlen, d_model)
        io_spec = pl.BlockSpec((qlen, d_model), lambda b: (b, 0))
        out_shape = jax.ShapeDtypeStruct((bsz * qlen, d_model), jnp.float32)

    kernel = functools.partial(_fused_attn_kernel, scale, n_head, d_head, cd,
                               exact_recip)
    out2d = pl.pallas_call(
        kernel,
        out_shape=out_shape,
        grid=(bsz,),
        in_specs=[
            io_spec,
            pl.BlockSpec((d_model, 3 * H), lambda b: (0, 0)),   # resident weights
            pl.BlockSpec((rlen, H), lambda b: (0, 0)),
            pl.BlockSpec((2, H), lambda b: (0, 0)),
            pl.BlockSpec((H, d_model), lambda b: (0, 0)),
            pl.BlockSpec((1, d_model), lambda b: (0, 0)),
            pl.BlockSpec((1, d_model), lambda b: (0, 0)),
        ],
        out_specs=io_spec,
        compiler_params=_compiler_params(1),
    )(w2d, wqkv_t, rk2d, bias2, wo_t, ln_g, ln_b)

    if lane_fast:
        return out2d.reshape(qlen, bsz, d_model)        # free reshape
    return out2d.reshape(bsz, qlen, d_model).transpose(1, 0, 2)


# --------------------------- pure-JAX reference ------------------------------

def _rel_shift_ref(x):
    b, n, q, k = x.shape
    zero_pad = jnp.zeros((b, n, q, 1), dtype=x.dtype)
    x_padded = jnp.concatenate([zero_pad, x], axis=3)
    x_padded = x_padded.reshape(b, n, k + 1, q)
    return x_padded[:, :, 1:, :].reshape(b, n, q, k)


def reference_forward(w, r, r_w_bias, r_r_bias, attn_mask, params, *, n_head, d_head):
    qlen, bsz, d_model = w.shape
    rlen = r.shape[0]
    scale = 1.0 / d_head ** 0.5
    hp = lax.Precision.HIGHEST

    w_heads = jnp.einsum("ibm,hm->ibh", w, params["Wqkv"], precision=hp)
    r_head_k = jnp.einsum("rm,hm->rh", r, params["Wr"], precision=hp)
    q_, k_, v_ = jnp.split(w_heads, 3, axis=-1)
    klen = k_.shape[0]
    q_ = q_.reshape(qlen, bsz, n_head, d_head)
    k_ = k_.reshape(klen, bsz, n_head, d_head)
    v_ = v_.reshape(klen, bsz, n_head, d_head)
    rk = r_head_k.reshape(rlen, n_head, d_head)

    AC = jnp.einsum("ibnd,jbnd->bnij", q_ + r_w_bias, k_, precision=hp)
    BD = jnp.einsum("ibnd,jnd->bnij", q_ + r_r_bias, rk, precision=hp)
    BD = _rel_shift_ref(BD)

    score = (AC + BD) * scale
    score = jnp.where(attn_mask[None, None, :, :], -jnp.inf, score)
    prob = jax.nn.softmax(score, axis=3)
    vec = jnp.einsum("bnij,jbnd->ibnd", prob, v_, precision=hp)
    vec = vec.reshape(qlen, bsz, n_head * d_head)
    attn_out = jnp.einsum("ibh,mh->ibm", vec, params["Wo"], precision=hp)

    x = w + attn_out
    mu = x.mean(-1, keepdims=True)
    var = ((x - mu) ** 2).mean(-1, keepdims=True)
    return (x - mu) / jnp.sqrt(var + 1e-5) * params["ln_g"] + params["ln_b"]


# ---------------------------------- main -------------------------------------

if __name__ == "__main__":
    n_head, d_model, d_head = 4, 128, 32
    qlen, bsz = 128, 2
    rlen = qlen  # no mems -> klen == rlen == qlen

    key = jax.random.PRNGKey(0)
    keys = jax.random.split(key, 8)
    init = lambda k, shape: 0.05 * jax.random.normal(k, shape, dtype=jnp.float32)

    params = {
        "Wqkv": init(keys[0], (3 * n_head * d_head, d_model)),   # qkv_net.weight
        "Wr":   init(keys[1], (n_head * d_head, d_model)),       # r_net.weight
        "Wo":   init(keys[2], (d_model, n_head * d_head)),       # o_net.weight
        "ln_g": jnp.ones((d_model,), jnp.float32),               # layer_norm.weight
        "ln_b": jnp.zeros((d_model,), jnp.float32),              # layer_norm.bias
    }
    r_w_bias = init(keys[3], (n_head, d_head))
    r_r_bias = init(keys[4], (n_head, d_head))

    w = jax.random.normal(keys[5], (qlen, bsz, d_model), dtype=jnp.float32)
    r = jax.random.normal(keys[6], (rlen, d_model), dtype=jnp.float32)
    attn_mask = jnp.triu(jnp.ones((qlen, qlen), dtype=jnp.bool_), k=1)  # causal

    ref = reference_forward(w, r, r_w_bias, r_r_bias, attn_mask, params,
                            n_head=n_head, d_head=d_head)

    # exact path (f32 compute) -> tight tolerance
    out_f32 = rel_partial_learnable_mha(w, r, r_w_bias, r_r_bias, attn_mask,
                                        params, n_head=n_head, d_head=d_head,
                                        compute_dtype=jnp.float32)
    out_f32 = jax.block_until_ready(out_f32)
    assert out_f32.shape == (qlen, bsz, d_model)
    err32 = float(jnp.max(jnp.abs(out_f32 - ref)))
    assert jnp.allclose(out_f32, ref, atol=2e-3, rtol=2e-3), f"f32 max_err={err32}"

    # default fast path (bf16 MXU compute, f32 accumulation/softmax) -> looser tol
    out_bf16 = rel_partial_learnable_mha(w, r, r_w_bias, r_r_bias, attn_mask,
                                         params, n_head=n_head, d_head=d_head)
    out_bf16 = jax.block_until_ready(out_bf16)
    errbf = float(jnp.max(jnp.abs(out_bf16 - ref)))
    assert jnp.allclose(out_bf16, ref, atol=3e-2, rtol=3e-2), f"bf16 max_err={errbf}"

    print("KERNEL_OK")
</pallas_src>

<mosaic_0001>
module attributes {stable_mosaic.version = 11 : i64} {
  func.func @_matmul_kernel(%arg0: i32, %arg1: memref<128x128xf32, #tpu.memory_space<vmem>>, %arg2: memref<128x128xf32, #tpu.memory_space<vmem>>, %arg3: memref<128x128xf32, #tpu.memory_space<vmem>>) attributes {dimension_semantics = [#tpu.dimension_semantics<parallel>], iteration_bounds = array<i64: 1>, scalar_prefetch = 0 : i64, scratch_operands = 0 : i64, tpu.core_type = #tpu.core_type<tc>, window_params = [{transform_indices = @transform_0, window_bounds = array<i64: 128, 128>}, {pipeline_mode = #tpu.pipeline_mode<synchronous>, transform_indices = @transform_1, window_bounds = array<i64: 128, 128>}, {transform_indices = @transform_2, window_bounds = array<i64: 128, 128>}]} {
    %c0 = arith.constant 0 : index
    %c0_0 = arith.constant 0 : index
    %0 = vector.load %arg1[%c0, %c0_0] : memref<128x128xf32, #tpu.memory_space<vmem>>, vector<128x128xf32>
    %c0_1 = arith.constant 0 : index
    %c0_2 = arith.constant 0 : index
    %1 = vector.load %arg2[%c0_1, %c0_2] : memref<128x128xf32, #tpu.memory_space<vmem>>, vector<128x128xf32>
    %cst = arith.constant dense<0.000000e+00> : vector<128x128xf32>
    %2 = tpu.matmul %0, %1, %cst {dimension_numbers = #tpu.dot_dimension_numbers<[1], [0], [0], [1], [0, 0, 1, 1], [], []>} : vector<128x128xf32>, vector<128x128xf32>, vector<128x128xf32> -> vector<128x128xf32>
    %c0_3 = arith.constant 0 : index
    %c0_4 = arith.constant 0 : index
    %3 = vector.load %arg3[%c0_3, %c0_4] : memref<128x128xf32, #tpu.memory_space<vmem>>, vector<128x128xf32>
    tpu.vector_store %arg3[%c0_3, %c0_4], %2 {strides = array<i32>} : memref<128x128xf32, #tpu.memory_space<vmem>>, vector<128x128xf32>,
    return
  }
  func.func @transform_0(%arg0: i32) -> (i32, i32) {
    %c0_i32 = arith.constant 0 : i32
    %c0_i32_0 = arith.constant 0 : i32
    return %arg0, %c0_i32 : i32, i32
  }
  func.func @transform_1(%arg0: i32) -> (i32, i32) {
    %c0_i32 = arith.constant 0 : i32
    %c0_i32_0 = arith.constant 0 : i32
    %c0_i32_1 = arith.constant 0 : i32
    return %c0_i32, %c0_i32_0 : i32, i32
  }
  func.func @transform_2(%arg0: i32) -> (i32, i32) {
    %c0_i32 = arith.constant 0 : i32
    %c0_i32_0 = arith.constant 0 : i32
    return %arg0, %c0_i32 : i32, i32
  }
}

</mosaic_0001>

<bundles_post_ra>
// kernel: tpu_custom_call.1
= control target key start
LH: loop header
LB: loop body
LE: loop exit
PB: predicated region body
PF: predicated region fallthrough
CT: control target
= control target key end

     0   :  { %7 = vsyncpa [#allocation3], 0  ;;  %s346_s0 = inlined_call_operand.hbm [shape: f32[128,128], index: 0, kind: input, shape index: {}]   ;;  %s347_s1 = inlined_call_operand.hbm [shape: f32[128,128], index: 1, kind: input, shape index: {}]   ;;  %s348_s2 = inlined_call_operand.hbm [shape: f32[128,128], index: 2, kind: output, shape index: {}]  }
   0x1   :  { %8 = vsyncpa [#allocation6], 0 }
   0x2   :  { %9 = vsyncpa [#allocation4], 0  ;;  %s14_s11 = sshll.u32 %s346_s0, 4  ;;  %s308_s12 = smov [#allocation2]   ;;  %s15_s11 = int_to_ptr.hbm [resolvable:$true] %s14_s11 }
   0x3   :  { %s16_s13 = sshll.u32 %s308_s12, 4  ;;  %s27_s16 = sshll.u32 %s347_s1, 4  ;;  %s17_s13 = int_to_ptr.vmem [resolvable:$true] %s16_s13  ;;  %s28_s16 = int_to_ptr.hbm [resolvable:$true] %s27_s16 }
   0x4   :  { %s309_s17 = smov 128   ;;  %s310_s18 = smov 8  }
   0x5   :  { %22 = dma.hbm_to_vmem [thread:$0]  %s15_s11, 2048, %s17_s13, [#allocation3], %s309_s17, %s309_s17, %s310_s18  }
   0x6   :  { %s311_s19 = smov [#allocation5]  }
   0x7   :  { %s29_s20 = sshll.u32 %s311_s19, 4  ;;  %s30_s20 = int_to_ptr.vmem [resolvable:$true] %s29_s20 }
   0x8   :  { %35 = dma.hbm_to_vmem [thread:$0]  %s28_s16, 2048, %s30_s20, [#allocation6], %s309_s17, %s309_s17, %s310_s18  }
   0x9   :  { %302 = dma.done.wait [#allocation3], 2048  }
   0xa   :  { %303 = vsyncadd [#allocation3], 4294965248 }
   0xb   :  { %304 = dma.done.wait [#allocation6], 2048  }
   0xc   :  { %305 = vsyncadd [#allocation6], 4294965248  ;;  %v75_v0 = vld [vmem:[#allocation5 + $0x78] sm:$0xff]  ;;  %v74_v1 = vld [vmem:[#allocation5 + $0x70] sm:$0xff]  ;;  %s312_s0 = smov [#allocation7]   ;;  %s163_s23 = sshll.u32 %s348_s2, 4  ;;  %s164_s23 = int_to_ptr.hbm [resolvable:$true] %s163_s23 }
   0xd   :  { %178 = vmatpush.msra.mxu2 %v75_v0  ;;  %179 = vmatpush.msra.mxu3 %v75_v0  ;;  %v73_v2 = vld [vmem:[#allocation5 + $0x68] sm:$0xff]  ;;  %v72_v3 = vld [vmem:[#allocation5 + $0x60] sm:$0xff]  ;;  %v71_v4 = vld [vmem:[#allocation5 + $0x58] sm:$0xff]  ;;  %s161_s1 = sshll.u32 %s312_s0, 4  ;;  %s162_s1 = int_to_ptr.vmem [resolvable:$true] %s161_s1 }
   0xe   :  { %76 = vmatpush.msra.mxu0 %v75_v0  ;;  %177 = vmatpush.msra.mxu1 %v75_v0  ;;  %v70_v5 = vld [vmem:[#allocation5 + $0x50] sm:$0xff]  ;;  %v69_v6 = vld [vmem:[#allocation5 + $0x48] sm:$0xff]  ;;  %v68_v7 = vld [vmem:[#allocation5 + $0x40] sm:$0xff] }
   0xf   :  { %181 = vmatpush.msra.mxu2 %v74_v1  ;;  %182 = vmatpush.msra.mxu3 %v74_v1  ;;  %v67_v8 = vld [vmem:[#allocation5 + $0x38] sm:$0xff]  ;;  %v66_v9 = vld [vmem:[#allocation5 + $0x30] sm:$0xff]  ;;  %v65_v10 = vld [vmem:[#allocation5 + $0x28] sm:$0xff] }
  0x10   :  { %77 = vmatpush.msra.mxu0 %v74_v1  ;;  %180 = vmatpush.msra.mxu1 %v74_v1  ;;  %v64_v11 = vld [vmem:[#allocation5 + $0x20] sm:$0xff]  ;;  %v63_v12 = vld [vmem:[#allocation5 + $0x18] sm:$0xff]  ;;  %v62_v13 = vld [vmem:[#allocation5 + $0x10] sm:$0xff] }
  0x11   :  { %184 = vmatpush.msra.mxu2 %v73_v2  ;;  %185 = vmatpush.msra.mxu3 %v73_v2  ;;  %v61_v14 = vld [vmem:[#allocation5 + $0x8] sm:$0xff]  ;;  %v60_v15 = vld [vmem:[#allocation5] sm:$0xff]  ;;  %v54_v24 = vld [vmem:[#allocation2 + $0x50] sm:$0xff] }
  0x12   :  { %78 = vmatpush.msra.mxu0 %v73_v2  ;;  %183 = vmatpush.msra.mxu1 %v73_v2  ;;  %v52_v16 = vld [vmem:[#allocation2 + $0x40] sm:$0xff]  ;;  %v53_v20 = vld [vmem:[#allocation2 + $0x48] sm:$0xff]  ;;  %v58_v25 = vld [vmem:[#allocation2 + $0x70] sm:$0xff] }
  0x13   :  { %187 = vmatpush.msra.mxu2 %v72_v3  ;;  %188 = vmatpush.msra.mxu3 %v72_v3  ;;  %v56_v17 = vld [vmem:[#allocation2 + $0x60] sm:$0xff]  ;;  %v57_v21 = vld [vmem:[#allocation2 + $0x68] sm:$0xff]  ;;  %v46_v26 = vld [vmem:[#allocation2 + $0x10] sm:$0xff] }
  0x14   :  { %79 = vmatpush.msra.mxu0 %v72_v3  ;;  %186 = vmatpush.msra.mxu1 %v72_v3  ;;  %v44_v18 = vld [vmem:[#allocation2] sm:$0xff]  ;;  %v45_v22 = vld [vmem:[#allocation2 + $0x8] sm:$0xff]  ;;  %v50_v27 = vld [vmem:[#allocation2 + $0x30] sm:$0xff] }
  0x15   :  { %190 = vmatpush.msra.mxu2 %v71_v4  ;;  %191 = vmatpush.msra.mxu3 %v71_v4  ;;  %v48_v19 = vld [vmem:[#allocation2 + $0x20] sm:$0xff]  ;;  %v49_v23 = vld [vmem:[#allocation2 + $0x28] sm:$0xff]  ;;  %v55_v28 = vld [vmem:[#allocation2 + $0x58] sm:$0xff] }
  0x16   :  { %80 = vmatpush.msra.mxu0 %v71_v4  ;;  %189 = vmatpush.msra.mxu1 %v71_v4  ;;  %v59_v29 = vld [vmem:[#allocation2 + $0x78] sm:$0xff] }
  0x17   :  { %193 = vmatpush.msra.mxu2 %v70_v5  ;;  %194 = vmatpush.msra.mxu3 %v70_v5  ;;  %v47_v30 = vld [vmem:[#allocation2 + $0x18] sm:$0xff] }
  0x18   :  { %81 = vmatpush.msra.mxu0 %v70_v5  ;;  %192 = vmatpush.msra.mxu1 %v70_v5  ;;  %v51_v31 = vld [vmem:[#allocation2 + $0x38] sm:$0xff] }
  0x19   :  { %196 = vmatpush.msra.mxu2 %v69_v6  ;;  %197 = vmatpush.msra.mxu3 %v69_v6 }
  0x1a   :  { %82 = vmatpush.msra.mxu0 %v69_v6  ;;  %195 = vmatpush.msra.mxu1 %v69_v6 }
  0x1b   :  { %199 = vmatpush.msra.mxu2 %v68_v7  ;;  %200 = vmatpush.msra.mxu3 %v68_v7 }
  0x1c   :  { %83 = vmatpush.msra.mxu0 %v68_v7  ;;  %198 = vmatpush.msra.mxu1 %v68_v7 }
  0x1d   :  { %202 = vmatpush.msra.mxu2 %v67_v8  ;;  %203 = vmatpush.msra.mxu3 %v67_v8 }
  0x1e   :  { %84 = vmatpush.msra.mxu0 %v67_v8  ;;  %201 = vmatpush.msra.mxu1 %v67_v8 }
  0x1f   :  { %205 = vmatpush.msra.mxu2 %v66_v9  ;;  %206 = vmatpush.msra.mxu3 %v66_v9 }
  0x20   :  { %85 = vmatpush.msra.mxu0 %v66_v9  ;;  %204 = vmatpush.msra.mxu1 %v66_v9 }
  0x21   :  { %208 = vmatpush.msra.mxu2 %v65_v10  ;;  %209 = vmatpush.msra.mxu3 %v65_v10 }
  0x22   :  { %86 = vmatpush.msra.mxu0 %v65_v10  ;;  %207 = vmatpush.msra.mxu1 %v65_v10 }
  0x23   :  { %211 = vmatpush.msra.mxu2 %v64_v11  ;;  %212 = vmatpush.msra.mxu3 %v64_v11 }
  0x24   :  { %87 = vmatpush.msra.mxu0 %v64_v11  ;;  %210 = vmatpush.msra.mxu1 %v64_v11 }
  0x25   :  { %214 = vmatpush.msra.mxu2 %v63_v12  ;;  %215 = vmatpush.msra.mxu3 %v63_v12 }
  0x26   :  { %88 = vmatpush.msra.mxu0 %v63_v12  ;;  %213 = vmatpush.msra.mxu1 %v63_v12 }
  0x27   :  { %217 = vmatpush.msra.mxu2 %v62_v13  ;;  %218 = vmatpush.msra.mxu3 %v62_v13 }
  0x28   :  { %89 = vmatpush.msra.mxu0 %v62_v13  ;;  %216 = vmatpush.msra.mxu1 %v62_v13 }
  0x29   :  { %220 = vmatpush.msra.mxu2 %v61_v14  ;;  %221 = vmatpush.msra.mxu3 %v61_v14 }
  0x2a   :  { %90 = vmatpush.msra.mxu0 %v61_v14  ;;  %219 = vmatpush.msra.mxu1 %v61_v14 }
  0x2b   :  { %223 = vmatpush.msra.mxu2 %v60_v15  ;;  %224 = vmatpush.msra.mxu3 %v60_v15 }
  0x2c   :  { %116 = vmatmul.f32.vlgmr.msra.gmra.mxu2 %v52_v16  ;;  %128 = vmatmul.f32.vlgmr.msra.gmra.mxu3 %v56_v17 }
  0x2d   :  { %91 = vmatpush.msra.mxu0 %v60_v15  ;;  %222 = vmatpush.msra.mxu1 %v60_v15 }
  0x2e   :  { %92 = vmatmul.f32.vlgmr.msra.gmra.mxu0 %v44_v18  ;;  %104 = vmatmul.f32.vlgmr.msra.gmra.mxu1 %v48_v19 }
  0x34   :  { %119 = vmatmul.f32.gmra.mxu2 %v53_v20  ;;  %131 = vmatmul.f32.gmra.mxu3 %v57_v21 }
  0x36   :  { %95 = vmatmul.f32.gmra.mxu0 %v45_v22  ;;  %107 = vmatmul.f32.gmra.mxu1 %v49_v23 }
  0x3c   :  { %122 = vmatmul.f32.gmra.mxu2 %v54_v24  ;;  %134 = vmatmul.f32.gmra.mxu3 %v58_v25 }
  0x3e   :  { %98 = vmatmul.f32.gmra.mxu0 %v46_v26  ;;  %110 = vmatmul.f32.gmra.mxu1 %v50_v27 }
  0x44   :  { %125 = vmatmul.f32.gmra.mxu2 %v55_v28  ;;  %137 = vmatmul.f32.gmra.mxu3 %v59_v29 }
  0x46   :  { %101 = vmatmul.f32.gmra.mxu0 %v47_v30  ;;  %113 = vmatmul.f32.gmra.mxu1 %v51_v31 }
  0xab   :  { %v93_v32 = vpop.f32.mrf.mxu0  ;;  %v105_v33 = vpop.f32.mrf.mxu1 }
  0xac   :  { %141 = vst [vmem:[#allocation7] sm:$0xff] %v93_v32 }
  0xad   :  { %145 = vst [vmem:[#allocation7 + $0x20] sm:$0xff] %v105_v33 }
  0xaf   :  { %v117_v34 = vpop.f32.mrf.mxu2  ;;  %v129_v35 = vpop.f32.mrf.mxu3 }
  0xb0   :  { %149 = vst [vmem:[#allocation7 + $0x40] sm:$0xff] %v117_v34 }
  0xb1   :  { %153 = vst [vmem:[#allocation7 + $0x60] sm:$0xff] %v129_v35 }
  0xb3   :  { %v96_v36 = vpop.f32.mrf.mxu0  ;;  %v108_v37 = vpop.f32.mrf.mxu1 }
  0xb4   :  { %142 = vst [vmem:[#allocation7 + $0x8] sm:$0xff] %v96_v36 }
  0xb5   :  { %146 = vst [vmem:[#allocation7 + $0x28] sm:$0xff] %v108_v37 }
  0xb7   :  { %v120_v38 = vpop.f32.mrf.mxu2  ;;  %v132_v39 = vpop.f32.mrf.mxu3 }
  0xb8   :  { %150 = vst [vmem:[#allocation7 + $0x48] sm:$0xff] %v120_v38 }
  0xb9   :  { %154 = vst [vmem:[#allocation7 + $0x68] sm:$0xff] %v132_v39 }
  0xbb   :  { %v99_v40 = vpop.f32.mrf.mxu0  ;;  %v111_v41 = vpop.f32.mrf.mxu1 }
  0xbc   :  { %143 = vst [vmem:[#allocation7 + $0x10] sm:$0xff] %v99_v40 }
  0xbd   :  { %147 = vst [vmem:[#allocation7 + $0x30] sm:$0xff] %v111_v41 }
  0xbf   :  { %v123_v42 = vpop.f32.mrf.mxu2  ;;  %v135_v43 = vpop.f32.mrf.mxu3 }
  0xc0   :  { %151 = vst [vmem:[#allocation7 + $0x50] sm:$0xff] %v123_v42 }
  0xc1   :  { %155 = vst [vmem:[#allocation7 + $0x70] sm:$0xff] %v135_v43 }
  0xc3   :  { %v102_v44 = vpop.f32.mrf.mxu0  ;;  %v114_v45 = vpop.f32.mrf.mxu1 }
  0xc4   :  { %144 = vst [vmem:[#allocation7 + $0x18] sm:$0xff] %v102_v44 }
  0xc5   :  { %148 = vst [vmem:[#allocation7 + $0x38] sm:$0xff] %v114_v45 }
  0xc7   :  { %v126_v46 = vpop.f32.mrf.mxu2  ;;  %v138_v47 = vpop.f32.mrf.mxu3 }
  0xc8   :  { %152 = vst [vmem:[#allocation7 + $0x58] sm:$0xff] %v126_v46 }
  0xc9   :  { %156 = vst [vmem:[#allocation7 + $0x78] sm:$0xff] %v138_v47 }
  0xca   :  { %169 = dma.vmem_to_hbm [thread:$0]  %s162_s1, 2048, %s164_s23, [#allocation4], %s309_s17, %s309_s17, %s310_s18  }
  0xcb   :  { %306 = dma.done.wait [#allocation4], 2048  }
  0xcc   :  { %307 = vsyncadd [#allocation4], 4294965248 }
  0xcd   :  { %174 = vsyncpa [#allocation3], 1 }
  0xce   :  { %175 = vsyncpa [#allocation6], 1 }
  0xcf   :  { %176 = vsyncpa [#allocation4], 1 }

</bundles_post_ra>
